<compile_context>
chip_gen: v5e
topology: v5e:2x2
jax: 0.10.0
libtpu: 0.0.40
codegen_flags: <defaults>
</compile_context>

<pallas_src>
import functools

import jax
import jax.numpy as jnp
from jax import lax
from jax.experimental import pallas as pl
from jax.experimental.pallas import tpu as pltpu


def _round_up(x, n):
    return ((x + n - 1) // n) * n


def _contracting_block_kernel(lhs_ref, w_ref, b_ref, o_ref, *scratch,
                              m_tile, m_valid, num_m, use_bn, neg_slope):
    """Per grid step (n, m): one (m_tile, Kp) @ (Kp, Cp) MXU contraction.

    lhs_ref : (m_tile, Kp) bf16   im2col rows of batch element n, spatial tile m
    w_ref   : (Kp, Cp)     bf16   folded 3x3 conv weight (zero padded, resident)
    b_ref   : (1, Cp)      f32    conv bias (zero padded)
    o_ref   : (M_pad, Cp)  bf16   per-batch output, VMEM-resident across the m axis
    scratch : (conv_ref (M_pad, Cp) f32, sum_ref (1, Cp) f32) when use_bn
    """
    m = pl.program_id(1)
    cp = o_ref.shape[-1]

    # Single fused MXU contraction with f32 accumulation; bias in f32.
    acc = jnp.dot(lhs_ref[...], w_ref[...], preferred_element_type=jnp.float32)
    acc = acc + b_ref[...]                                   # (m_tile, Cp) f32

    row0 = pl.multiple_of(m * m_tile, m_tile)
    ragged = (m_valid % m_tile) != 0                         # static

    if not use_bn:
        # No InstanceNorm: activation per tile, store bf16 directly.
        y = jnp.maximum(acc, neg_slope * acc)
        o_ref[pl.ds(row0, m_tile), :] = y.astype(o_ref.dtype)
        return

    conv_ref, sum_ref = scratch

    @pl.when(m == 0)
    def _init():
        sum_ref[...] = jnp.zeros_like(sum_ref)

    # Stash pre-norm rows (f32) and accumulate per-channel sums over VALID rows.
    conv_ref[pl.ds(row0, m_tile), :] = acc
    if ragged:
        gidx = row0 + lax.broadcasted_iota(jnp.int32, (m_tile, 1), 0)
        acc_valid = jnp.where(gidx < m_valid, acc, 0.0)
    else:
        acc_valid = acc
    sum_ref[...] += jnp.sum(acc_valid, axis=0, keepdims=True)

    @pl.when(m == num_m - 1)
    def _finalize():
        inv_m = 1.0 / m_valid
        mean = sum_ref[...] * inv_m                          # (1, Cp)

        # Second (centered) pass over the resident scratch, tile-chunked so no
        # full-image temporaries are materialized.
        def sq_body(t, csq):
            r0 = pl.multiple_of(t * m_tile, m_tile)
            d = conv_ref[pl.ds(r0, m_tile), :] - mean
            if ragged:
                g = r0 + lax.broadcasted_iota(jnp.int32, (m_tile, 1), 0)
                d = jnp.where(g < m_valid, d, 0.0)
            return csq + jnp.sum(d * d, axis=0, keepdims=True)

        csq = lax.fori_loop(0, num_m, sq_body,
                            jnp.zeros((1, cp), jnp.float32), unroll=num_m <= 8)
        scale = lax.rsqrt(csq * inv_m + 1e-5)                # (1, Cp)

        # Normalize + activation + bf16 store, tile-chunked.
        def out_body(t, carry):
            r0 = pl.multiple_of(t * m_tile, m_tile)
            y = (conv_ref[pl.ds(r0, m_tile), :] - mean) * scale
            y = jnp.maximum(y, neg_slope * y)
            o_ref[pl.ds(r0, m_tile), :] = y.astype(o_ref.dtype)
            return carry

        lax.fori_loop(0, num_m, out_body, 0, unroll=num_m <= 8)


def contracting_block(x_nchw, weight_hwio, bias, *, use_bn=True, activation="relu",
                      m_tile=None, nchw_f32_output=True):
    """x_nchw: (N, C, H, W) f32; weight_hwio: (3, 3, C, 2C); bias: (2C,).

    Returns (N, 2C, (H+1)//2, (W+1)//2) f32 (PyTorch NCHW convention) when
    nchw_f32_output, else lane-friendly NHWC bf16 for chaining into the next block
    (skips the extra full read+write of the output that the NCHW transpose costs)."""
    N, C, H, W = x_nchw.shape
    KH, KW, Cin, Cout = weight_hwio.shape
    assert Cin == C and Cout == 2 * C and KH == 3 and KW == 3
    assert H >= 2 and W >= 2                      # reflect pad of 1 needs >= 2 pixels

    Ho, Wo = (H + 1) // 2, (W + 1) // 2           # PyTorch Conv2d(k=3,s=2,p=1) out size
    M = Ho * Wo
    K = KH * KW * Cin
    LANE = 128
    SUB = 16                                      # bf16 sublane packing granularity
    Cp = _round_up(Cout, LANE)                    # lane-dense output channels
    Kp = _round_up(K, LANE)                       # lane-dense contraction dim
    neg_slope = 0.0 if activation == "relu" else 0.2

    # Spatial tile (rows of the (M, K) im2col matrix) streamed per grid step.
    if m_tile is None:
        m_tile = 512
    m_tile = max(SUB, min(_round_up(m_tile, SUB), _round_up(M, SUB)))
    M_pad = _round_up(M, m_tile)
    num_m = M_pad // m_tile

    # ---- layout glue in plain JAX, all in bf16 (halves glue HBM traffic) ----
    x = jnp.transpose(x_nchw, (0, 2, 3, 1)).astype(jnp.bfloat16)       # NHWC bf16
    x_pad = jnp.pad(x, ((0, 0), (1, 1), (1, 1), (0, 0)), mode="reflect")
    # TODO(synk): longer term, eliminate the materialized im2col: pass the reflect
    # padded NHWC input (memory_space=pl.ANY / row-band BlockSpec) and form the 9
    # taps in-kernel to cut lhs HBM traffic ~2-3x on this memory-bound kernel.
    taps = []
    for kh in range(KH):
        for kw in range(KW):
            taps.append(
                lax.slice(x_pad, (0, kh, kw, 0),
                          (N, kh + 2 * Ho - 1, kw + 2 * Wo - 1, Cin),
                          (1, 2, 2, 1)))                                # (N, Ho, Wo, Cin)
    lhs = jnp.stack(taps, axis=3).reshape(N, M, K)
    lhs = jnp.pad(lhs, ((0, 0), (0, M_pad - M), (0, Kp - K)))           # zero rows / K

    # Folded conv weight (Kp, Cp) bf16, bias (1, Cp) f32 (zero padded).
    w = weight_hwio.reshape(K, Cout).astype(jnp.bfloat16)
    w = jnp.pad(w, ((0, Kp - K), (0, Cp - Cout)))
    b = jnp.pad(bias.astype(jnp.float32), (0, Cp - Cout)).reshape(1, Cp)

    kernel = functools.partial(
        _contracting_block_kernel, m_tile=m_tile, m_valid=M, num_m=num_m,
        use_bn=use_bn, neg_slope=neg_slope)

    scratch_shapes = []
    if use_bn:
        scratch_shapes = [pltpu.VMEM((M_pad, Cp), jnp.float32),   # pre-norm conv rows
                          pltpu.VMEM((1, Cp), jnp.float32)]       # per-channel sums

    # Per-generation VMEM budget: resident scratch + resident out + 2x-buffered blocks.
    est = (M_pad * Cp * 4              # f32 conv scratch
           + 2 * M_pad * Cp * 2        # bf16 resident output block (conservative 2x)
           + 2 * m_tile * Kp * 2       # double-buffered lhs tiles
           + 2 * Kp * Cp * 2           # weight
           + 2 * Cp * 4 + Cp * 4)      # bias + stats
    try:
        vmem_cap = pltpu.get_tpu_info().vmem_capacity_bytes
    except Exception:                  # conservative fallback: v7x 64 MiB physical
        vmem_cap = 64 * 1024 * 1024
    vmem_limit = int(min((vmem_cap * 3) // 4, max(32 * 1024 * 1024, 2 * est)))

    out = pl.pallas_call(
        kernel,
        out_shape=jax.ShapeDtypeStruct((N, M_pad, Cp), jnp.bfloat16),
        grid_spec=pltpu.PrefetchScalarGridSpec(
            num_scalar_prefetch=0,
            grid=(N, num_m),
            in_specs=[
                pl.BlockSpec((pl.Squeezed(), m_tile, Kp), lambda n, m: (n, m, 0)),
                pl.BlockSpec((Kp, Cp), lambda n, m: (0, 0)),
                pl.BlockSpec((1, Cp), lambda n, m: (0, 0)),
            ],
            out_specs=pl.BlockSpec((pl.Squeezed(), M_pad, Cp),
                                   lambda n, m: (n, 0, 0)),
            scratch_shapes=scratch_shapes,
        ),
        compiler_params=pltpu.CompilerParams(
            # Batch elements are independent -> shard across TensorCores on v7x;
            # the spatial axis accumulates IN stats into resident scratch/output.
            dimension_semantics=("parallel", "arbitrary"),
            vmem_limit_bytes=vmem_limit,
        ),
    )(lhs, w, b)
    # TODO(synk): for N == 1 on v7x, parallelize the m axis across both TensorCores
    # (CMEM stats combine + core barrier) so the second core is not idle.

    out = out[:, :M, :Cout].reshape(N, Ho, Wo, Cout)
    if not nchw_f32_output:
        return out                     # lane-dense NHWC bf16 for the next block
    return jnp.transpose(out, (0, 3, 1, 2)).astype(jnp.float32)


def _reference(x_nchw, weight_hwio, bias, *, use_bn, activation, quantize_bf16):
    """Pure-JAX reference. quantize_bf16=True mirrors the kernel's conv numerics
    (bf16 operands, f32 accumulation); False is the pure fp32 PyTorch forward."""
    x = jnp.transpose(x_nchw, (0, 2, 3, 1)).astype(jnp.float32)
    x_pad = jnp.pad(x, ((0, 0), (1, 1), (1, 1), (0, 0)), mode="reflect")
    w = weight_hwio.astype(jnp.float32)
    if quantize_bf16:
        x_pad = x_pad.astype(jnp.bfloat16).astype(jnp.float32)
        w = w.astype(jnp.bfloat16).astype(jnp.float32)
    y = lax.conv_general_dilated(
        x_pad, w, window_strides=(2, 2), padding="VALID",
        dimension_numbers=("NHWC", "HWIO", "NHWC"),
        preferred_element_type=jnp.float32,
    ) + bias[None, None, None, :].astype(jnp.float32)
    if use_bn:
        mean = jnp.mean(y, axis=(1, 2), keepdims=True)
        var = jnp.mean((y - mean) ** 2, axis=(1, 2), keepdims=True)
        y = (y - mean) * lax.rsqrt(var + 1e-5)
    ns = 0.0 if activation == "relu" else 0.2
    return jnp.transpose(jnp.maximum(y, ns * y), (0, 3, 1, 2))


if __name__ == "__main__":
    key = jax.random.PRNGKey(0)
    k_x, k_w, k_b, k_x2 = jax.random.split(key, 4)

    N, C, H, W = 2, 4, 16, 16          # input_channels = 4 -> output channels = 8
    Cout = 2 * C

    x = jax.random.normal(k_x, (N, C, H, W), dtype=jnp.float32)
    weight = jax.random.normal(k_w, (3, 3, C, Cout), dtype=jnp.float32) * 0.1
    bias = jax.random.normal(k_b, (Cout,), dtype=jnp.float32) * 0.1

    run = jax.jit(contracting_block,
                  static_argnames=("use_bn", "activation", "m_tile",
                                   "nchw_f32_output"))

    # Case 1: default ReLU + InstanceNorm, two spatial tiles (exercises the
    # cross-tile stats accumulation + finalize path).
    out = jax.block_until_ready(run(x, weight, bias, m_tile=32))
    assert out.shape == (N, Cout, (H + 1) // 2, (W + 1) // 2)
    ref_q = _reference(x, weight, bias, use_bn=True, activation="relu",
                       quantize_bf16=True)
    ref_f = _reference(x, weight, bias, use_bn=True, activation="relu",
                       quantize_bf16=False)
    err_q = float(jnp.max(jnp.abs(out - ref_q)))
    err_f = float(jnp.max(jnp.abs(out - ref_f)))
    assert err_q < 2e-2, f"mismatch vs bf16-matched reference: {err_q}"
    assert err_f < 1e-1, f"semantic drift vs fp32 reference too large: {err_f}"

    # Case 2: odd spatial size (13x13 -> 7x7), M = 49 not a multiple of the tile
    # (exercises the padded-row masking and 4-tile pipeline).
    x2 = jax.random.normal(k_x2, (N, C, 13, 13), dtype=jnp.float32)
    out2 = jax.block_until_ready(run(x2, weight, bias, m_tile=16))
    assert out2.shape == (N, Cout, 7, 7)
    ref2 = _reference(x2, weight, bias, use_bn=True, activation="relu",
                      quantize_bf16=True)
    err2 = float(jnp.max(jnp.abs(out2 - ref2)))
    assert err2 < 2e-2, f"ragged-tile mismatch vs bf16-matched reference: {err2}"

    # Case 3: use_bn=False + LeakyReLU path.
    out3 = jax.block_until_ready(
        run(x, weight, bias, use_bn=False, activation="leaky", m_tile=32))
    ref3 = _reference(x, weight, bias, use_bn=False, activation="leaky",
                      quantize_bf16=True)
    err3 = float(jnp.max(jnp.abs(out3 - ref3)))
    assert err3 < 5e-2, f"no-IN LeakyReLU mismatch vs bf16-matched reference: {err3}"

    print("KERNEL_OK")
</pallas_src>

<mosaic_0001>
module attributes {stable_mosaic.version = 11 : i64} {
  func.func @_contracting_block_kernel(%arg0: i32, %arg1: i32, %arg2: memref<1x32x128xbf16, #tpu.memory_space<vmem>>, %arg3: memref<128x128xbf16, #tpu.memory_space<vmem>>, %arg4: memref<1x128xf32, #tpu.memory_space<vmem>>, %arg5: memref<1x64x128xbf16, #tpu.memory_space<vmem>>, %arg6: memref<64x128xf32, #tpu.memory_space<vmem>>, %arg7: memref<1x128xf32, #tpu.memory_space<vmem>>) attributes {dimension_semantics = [#tpu.dimension_semantics<parallel>, #tpu.dimension_semantics<arbitrary>], iteration_bounds = array<i64: 2, 2>, scalar_prefetch = 0 : i64, scratch_operands = 2 : i64, tpu.core_type = #tpu.core_type<tc>, window_params = [{transform_indices = @transform_0, window_bounds = array<i64: 1, 32, 128>}, {pipeline_mode = #tpu.pipeline_mode<synchronous>, transform_indices = @transform_1, window_bounds = array<i64: 128, 128>}, {pipeline_mode = #tpu.pipeline_mode<synchronous>, transform_indices = @transform_2, window_bounds = array<i64: 1, 128>}, {transform_indices = @transform_3, window_bounds = array<i64: 1, 64, 128>}]} {
    %c0 = arith.constant 0 : index
    %c0_0 = arith.constant 0 : index
    %c0_1 = arith.constant 0 : index
    %0 = vector.load %arg2[%c0, %c0_0, %c0_1] : memref<1x32x128xbf16, #tpu.memory_space<vmem>>, vector<1x32x128xbf16>
    %1 = vector.shape_cast %0 : vector<1x32x128xbf16> to vector<32x128xbf16>
    %c0_2 = arith.constant 0 : index
    %c0_3 = arith.constant 0 : index
    %2 = vector.load %arg3[%c0_2, %c0_3] : memref<128x128xbf16, #tpu.memory_space<vmem>>, vector<128x128xbf16>
    %cst = arith.constant dense<0.000000e+00> : vector<32x128xf32>
    %3 = tpu.matmul %1, %2, %cst {dimension_numbers = #tpu.dot_dimension_numbers<[1], [0], [0], [1], [0, 0, 1, 1], [], []>} : vector<32x128xbf16>, vector<128x128xbf16>, vector<32x128xf32> -> vector<32x128xf32>
    %c0_4 = arith.constant 0 : index
    %c0_5 = arith.constant 0 : index
    %4 = vector.load %arg4[%c0_4, %c0_5] : memref<1x128xf32, #tpu.memory_space<vmem>>, vector<1x128xf32>
    %5 = vector.broadcast %4 : vector<1x128xf32> to vector<32x128xf32>
    %6 = arith.addf %3, %5 : vector<32x128xf32>
    %c32_i32 = arith.constant 32 : i32
    %7 = arith.muli %arg1, %c32_i32 : i32
    %8 = tpu.assume_multiple %7, 32 : i32
    %c0_i32 = arith.constant 0 : i32
    %9 = arith.cmpi eq, %arg1, %c0_i32 : i32
    %10 = arith.extui %9 : i1 to i32
    %c0_i32_6 = arith.constant 0 : i32
    %11 = arith.cmpi ne, %10, %c0_i32_6 : i32
    scf.if %11 {
      %cst_14 = arith.constant 0.000000e+00 : f32
      %22 = vector.broadcast %cst_14 : f32 to vector<1x128xf32>
      %c0_15 = arith.constant 0 : index
      %c0_16 = arith.constant 0 : index
      %23 = vector.load %arg7[%c0_15, %c0_16] : memref<1x128xf32, #tpu.memory_space<vmem>>, vector<1x128xf32>
      tpu.vector_store %arg7[%c0_15, %c0_16], %22 {strides = array<i32>} : memref<1x128xf32, #tpu.memory_space<vmem>>, vector<1x128xf32>,
    } else {
    }
    %12 = arith.index_cast %8 : i32 to index
    %c0_7 = arith.constant 0 : index
    %13 = vector.load %arg6[%12, %c0_7] : memref<64x128xf32, #tpu.memory_space<vmem>>, vector<32x128xf32>
    tpu.vector_store %arg6[%12, %c0_7], %6 {strides = array<i32>} : memref<64x128xf32, #tpu.memory_space<vmem>>, vector<32x128xf32>,
    %c0_8 = arith.constant 0 : index
    %c0_9 = arith.constant 0 : index
    %14 = vector.load %arg7[%c0_8, %c0_9] : memref<1x128xf32, #tpu.memory_space<vmem>>, vector<1x128xf32>
    %cst_10 = arith.constant dense<0.000000e+00> : vector<128xf32>
    %15 = vector.multi_reduction <add>, %6, %cst_10 [0] : vector<32x128xf32> to vector<128xf32>
    %16 = vector.shape_cast %15 : vector<128xf32> to vector<1x128xf32>
    %17 = arith.addf %14, %16 : vector<1x128xf32>
    %c0_11 = arith.constant 0 : index
    %c0_12 = arith.constant 0 : index
    %18 = vector.load %arg7[%c0_11, %c0_12] : memref<1x128xf32, #tpu.memory_space<vmem>>, vector<1x128xf32>
    tpu.vector_store %arg7[%c0_11, %c0_12], %17 {strides = array<i32>} : memref<1x128xf32, #tpu.memory_space<vmem>>, vector<1x128xf32>,
    %c1_i32 = arith.constant 1 : i32
    %19 = arith.cmpi eq, %arg1, %c1_i32 : i32
    %20 = arith.extui %19 : i1 to i32
    %c0_i32_13 = arith.constant 0 : i32
    %21 = arith.cmpi ne, %20, %c0_i32_13 : i32
    scf.if %21 {
      %c0_14 = arith.constant 0 : index
      %c0_15 = arith.constant 0 : index
      %22 = vector.load %arg7[%c0_14, %c0_15] : memref<1x128xf32, #tpu.memory_space<vmem>>, vector<1x128xf32>
      %cst_16 = arith.constant 1.562500e-02 : f32
      %23 = vector.broadcast %cst_16 : f32 to vector<1x128xf32>
      %24 = arith.mulf %22, %23 : vector<1x128xf32>
      %cst_17 = arith.constant 0.000000e+00 : f32
      %25 = vector.broadcast %cst_17 : f32 to vector<1x128xf32>
      %c0_i32_18 = arith.constant 0 : i32
      %c32_i32_19 = arith.constant 32 : i32
      %26 = arith.muli %c0_i32_18, %c32_i32_19 : i32
      %27 = tpu.assume_multiple %26, 32 : i32
      %28 = arith.index_cast %27 : i32 to index
      %c0_20 = arith.constant 0 : index
      %29 = vector.load %arg6[%28, %c0_20] : memref<64x128xf32, #tpu.memory_space<vmem>>, vector<32x128xf32>
      %30 = vector.broadcast %24 : vector<1x128xf32> to vector<32x128xf32>
      %31 = arith.subf %29, %30 : vector<32x128xf32>
      %32 = arith.mulf %31, %31 : vector<32x128xf32>
      %cst_21 = arith.constant dense<0.000000e+00> : vector<128xf32>
      %33 = vector.multi_reduction <add>, %32, %cst_21 [0] : vector<32x128xf32> to vector<128xf32>
      %34 = vector.shape_cast %33 : vector<128xf32> to vector<1x128xf32>
      %35 = arith.addf %25, %34 : vector<1x128xf32>
      %c1_i32_22 = arith.constant 1 : i32
      %c32_i32_23 = arith.constant 32 : i32
      %36 = arith.muli %c1_i32_22, %c32_i32_23 : i32
      %37 = tpu.assume_multiple %36, 32 : i32
      %38 = arith.index_cast %37 : i32 to index
      %c0_24 = arith.constant 0 : index
      %39 = vector.load %arg6[%38, %c0_24] : memref<64x128xf32, #tpu.memory_space<vmem>>, vector<32x128xf32>
      %40 = vector.broadcast %24 : vector<1x128xf32> to vector<32x128xf32>
      %41 = arith.subf %39, %40 : vector<32x128xf32>
      %42 = arith.mulf %41, %41 : vector<32x128xf32>
      %cst_25 = arith.constant dense<0.000000e+00> : vector<128xf32>
      %43 = vector.multi_reduction <add>, %42, %cst_25 [0] : vector<32x128xf32> to vector<128xf32>
      %44 = vector.shape_cast %43 : vector<128xf32> to vector<1x128xf32>
      %45 = arith.addf %35, %44 : vector<1x128xf32>
      %c2_i32 = arith.constant 2 : i32
      %cst_26 = arith.constant 1.562500e-02 : f32
      %46 = vector.broadcast %cst_26 : f32 to vector<1x128xf32>
      %47 = arith.mulf %45, %46 : vector<1x128xf32>
      %cst_27 = arith.constant 9.99999974E-6 : f32
      %48 = vector.broadcast %cst_27 : f32 to vector<1x128xf32>
      %49 = arith.addf %47, %48 : vector<1x128xf32>
      %50 = math.rsqrt %49 : vector<1x128xf32>
      %c0_i32_28 = arith.constant 0 : i32
      %c32_i32_29 = arith.constant 32 : i32
      %51 = arith.muli %c0_i32_28, %c32_i32_29 : i32
      %52 = tpu.assume_multiple %51, 32 : i32
      %53 = arith.index_cast %52 : i32 to index
      %c0_30 = arith.constant 0 : index
      %54 = vector.load %arg6[%53, %c0_30] : memref<64x128xf32, #tpu.memory_space<vmem>>, vector<32x128xf32>
      %55 = vector.broadcast %24 : vector<1x128xf32> to vector<32x128xf32>
      %56 = arith.subf %54, %55 : vector<32x128xf32>
      %57 = vector.broadcast %50 : vector<1x128xf32> to vector<32x128xf32>
      %58 = arith.mulf %56, %57 : vector<32x128xf32>
      %cst_31 = arith.constant 0.000000e+00 : f32
      %59 = vector.broadcast %cst_31 : f32 to vector<32x128xf32>
      %60 = arith.mulf %59, %58 : vector<32x128xf32>
      %61 = arith.maximumf %58, %60 : vector<32x128xf32>
      %62 = arith.truncf %61 : vector<32x128xf32> to vector<32x128xbf16>
      %c0_32 = arith.constant 0 : index
      %63 = arith.index_cast %52 : i32 to index
      %c0_33 = arith.constant 0 : index
      %64 = vector.load %arg5[%c0_32, %63, %c0_33] : memref<1x64x128xbf16, #tpu.memory_space<vmem>>, vector<1x32x128xbf16>
      %65 = vector.shape_cast %64 : vector<1x32x128xbf16> to vector<32x128xbf16>
      %66 = vector.shape_cast %62 : vector<32x128xbf16> to vector<1x32x128xbf16>
      tpu.vector_store %arg5[%c0_32, %63, %c0_33], %66 {strides = array<i32>} : memref<1x64x128xbf16, #tpu.memory_space<vmem>>, vector<1x32x128xbf16>,
      %c1_i32_34 = arith.constant 1 : i32
      %c32_i32_35 = arith.constant 32 : i32
      %67 = arith.muli %c1_i32_34, %c32_i32_35 : i32
      %68 = tpu.assume_multiple %67, 32 : i32
      %69 = arith.index_cast %68 : i32 to index
      %c0_36 = arith.constant 0 : index
      %70 = vector.load %arg6[%69, %c0_36] : memref<64x128xf32, #tpu.memory_space<vmem>>, vector<32x128xf32>
      %71 = vector.broadcast %24 : vector<1x128xf32> to vector<32x128xf32>
      %72 = arith.subf %70, %71 : vector<32x128xf32>
      %73 = vector.broadcast %50 : vector<1x128xf32> to vector<32x128xf32>
      %74 = arith.mulf %72, %73 : vector<32x128xf32>
      %cst_37 = arith.constant 0.000000e+00 : f32
      %75 = vector.broadcast %cst_37 : f32 to vector<32x128xf32>
      %76 = arith.mulf %75, %74 : vector<32x128xf32>
      %77 = arith.maximumf %74, %76 : vector<32x128xf32>
      %78 = arith.truncf %77 : vector<32x128xf32> to vector<32x128xbf16>
      %c0_38 = arith.constant 0 : index
      %79 = arith.index_cast %68 : i32 to index
      %c0_39 = arith.constant 0 : index
      %80 = vector.load %arg5[%c0_38, %79, %c0_39] : memref<1x64x128xbf16, #tpu.memory_space<vmem>>, vector<1x32x128xbf16>
      %81 = vector.shape_cast %80 : vector<1x32x128xbf16> to vector<32x128xbf16>
      %82 = vector.shape_cast %78 : vector<32x128xbf16> to vector<1x32x128xbf16>
      tpu.vector_store %arg5[%c0_38, %79, %c0_39], %82 {strides = array<i32>} : memref<1x64x128xbf16, #tpu.memory_space<vmem>>, vector<1x32x128xbf16>,
      %c2_i32_40 = arith.constant 2 : i32
    } else {
    }
    return
  }
  func.func @transform_0(%arg0: i32, %arg1: i32) -> (i32, i32, i32) {
    %c0_i32 = arith.constant 0 : i32
    %c0_i32_0 = arith.constant 0 : i32
    return %arg0, %arg1, %c0_i32 : i32, i32, i32
  }
  func.func @transform_1(%arg0: i32, %arg1: i32) -> (i32, i32) {
    %c0_i32 = arith.constant 0 : i32
    %c0_i32_0 = arith.constant 0 : i32
    %c0_i32_1 = arith.constant 0 : i32
    return %c0_i32, %c0_i32_0 : i32, i32
  }
  func.func @transform_2(%arg0: i32, %arg1: i32) -> (i32, i32) {
    %c0_i32 = arith.constant 0 : i32
    %c0_i32_0 = arith.constant 0 : i32
    %c0_i32_1 = arith.constant 0 : i32
    return %c0_i32, %c0_i32_0 : i32, i32
  }
  func.func @transform_3(%arg0: i32, %arg1: i32) -> (i32, i32, i32) {
    %c0_i32 = arith.constant 0 : i32
    %c0_i32_0 = arith.constant 0 : i32
    %c0_i32_1 = arith.constant 0 : i32
    return %arg0, %c0_i32, %c0_i32_0 : i32, i32, i32
  }
}

</mosaic_0001>

<bundles_post_ra>
// kernel: contracting_block.1
= control target key start
LH: loop header
LB: loop body
LE: loop exit
PB: predicated region body
PF: predicated region fallthrough
CT: control target
= control target key end

     0   :  { %s720_s12 = smov 0   ;;  %s722_s13 = smov 0   ;;  %s810_s0 = inlined_call_operand.vmem [shape: bf16[2,64,128], index: 0, kind: input, shape index: {}]   ;;  %s811_s1 = inlined_call_operand.vmem [shape: bf16[128,128], index: 1, kind: input, shape index: {}]   ;;  %s812_s2 = inlined_call_operand.vmem [shape: f32[1,128], index: 2, kind: input, shape index: {}]   ;;  %s813_s3 = inlined_call_operand.vmem [shape: bf16[2,64,128], index: 3, kind: output, shape index: {}]  }
   0x1   :  { %s724_s14 = smov 0   ;;  %s726_s15 = smov 0  }
   0x2   :  { %s728_s16 = smov 0  }
   0x3 LB: > { %s22_s17 = sadd.s32 1, %s689_s14  ;;  %s25_s18 = sadd.s32 1, %s693_s15  ;;  %s697_s16 = sphi %s728_s16, %s13_s16   ;;  %s693_s15 = sphi %s726_s15, %s817_s15   ;;  %s689_s14 = sphi %s724_s14, %s816_s14   ;;  %s685_s13 = sphi %s722_s13, %s815_s13   ;;  %s681_s12 = sphi %s720_s12, %s814_s12  }
   0x4   : > { %p23_p0 = scmp.ge.s32.totalorder %s22_s17, 2  ;;  %p518_p1 = scmp.ge.s32.totalorder %s697_s16, 1 }
   0x5   : > { %p156_p2 = scmp.lt.s32.totalorder %s697_s16, 5 }
   0x6   : > { %s819_s17 = smov (%p23_p0, %s22_s17), 0  ;;  %s821_s18 = smov (!%p23_p0, %s25_s18), %s693_s15 }
   0x7   : > { %p157_p3 = pnand %p518_p1, %p156_p2  ;;  %p27_p4 = scmp.ge.s32.totalorder %s821_s18, 2 }
   0x8   : > { %p185_p5 = scmp.lt.s32.totalorder (!%p157_p3), %s685_s13, 1  ;;  %s519_s29 = sshll.u32 (!%p157_p3), %s681_s12, 2 }
   0x9   : > { %s823_s18 = smov (%p27_p4, %s821_s18), 0  ;;  %160 = sbr.rel (%p157_p3) target bundleno = 274 (0x112), region = 32 }
   0xa   : > { %p187_p6 = scmp.lt.s32.totalorder (!%p157_p3), %s519_s29, 7  ;;  %s564_s25 = sshll.u32 (!%p157_p3), %s681_s12, 5 }
   0xb   : > { %p565_p7 = scmp.ne.s32.totalorder (!%p157_p3), %s681_s12, 0 }
   0xe   : > { %v583_v0 = vld [vmem:[%s811_s1 + $0x38] sm:$0xff]  ;;  %v582_v1 = vld [vmem:[%s811_s1 + $0x30] sm:$0xff]  ;;  %s825_s13 = smov (!%p185_p5, %s685_s13), 1  ;;  %v581_v2 = vld [vmem:[%s811_s1 + $0x28] sm:$0xff]  ;;  %s827_s29 = smov (!%p187_p6, %s519_s29), 7 }
   0xf   : > { %283 = vmatpush.bf16.msra.mxu0 %v583_v0  ;;  %607 = vmatpush.bf16.msra.mxu1 %v583_v0  ;;  %s573_s23 = sshll.u32 %s825_s13, 5  ;;  %v580_v3 = vld [vmem:[%s811_s1 + $0x20] sm:$0xff]  ;;  %v579_v4 = vld [vmem:[%s811_s1 + $0x18] sm:$0xff]  ;;  %s520_s7 = sshll.u32 %s825_s13, 3  ;;  %v578_v5 = vld [vmem:[%s811_s1 + $0x10] sm:$0xff] }
  0x10   : > { %s761_s26 = scalar_lea.vmem %s813_s3, %s573_s23  ;;  %s190_s10 = sadd.s32 %s520_s7, %s827_s29  ;;  %v577_v6 = vld [vmem:[%s811_s1 + $0x8] sm:$0xff]  ;;  %v576_v7 = vld [vmem:[%s811_s1] sm:$0xff] }
  0x11   : > { %s521_s20 = sshll.u32 %s190_s10, 2  ;;  %v656_v10 = vld [vmem:[%s812_s2] ss:$0 sm:$0xff] }
  0x12   : > { %s192_s24 = scalar_lea.vmem %s810_s0, %s521_s20 }
  0x13   : > { %284 = vmatpush.bf16.msra.mxu0 %v582_v1  ;;  %608 = vmatpush.bf16.msra.mxu1 %v582_v1  ;;  %v574_v8 = vld [vmem:[%s192_s24] sm:$0xff]  ;;  %v575_v9 = vld [vmem:[%s192_s24 + $0x8] sm:$0xff] }
  0x17   : > { %285 = vmatpush.bf16.msra.mxu0 %v581_v2  ;;  %609 = vmatpush.bf16.msra.mxu1 %v581_v2 }
  0x1b   : > { %286 = vmatpush.bf16.msra.mxu0 %v580_v3  ;;  %610 = vmatpush.bf16.msra.mxu1 %v580_v3 }
  0x1f   : > { %287 = vmatpush.bf16.msra.mxu0 %v579_v4  ;;  %611 = vmatpush.bf16.msra.mxu1 %v579_v4 }
  0x23   : > { %288 = vmatpush.bf16.msra.mxu0 %v578_v5  ;;  %612 = vmatpush.bf16.msra.mxu1 %v578_v5 }
  0x27   : > { %289 = vmatpush.bf16.msra.mxu0 %v577_v6  ;;  %613 = vmatpush.bf16.msra.mxu1 %v577_v6 }
  0x2b   : > { %290 = vmatpush.bf16.msra.mxu0 %v576_v7  ;;  %614 = vmatpush.bf16.msra.mxu1 %v576_v7 }
  0x2e   : > { %291 = vmatmul.bf16.vlgmr.msra.gmra.mxu0 %v574_v8  ;;  %296 = vmatmul.bf16.vlgmr.msra.gmra.mxu1 %v575_v9 }
  0xab   : > { %v292_v11 = vpop.f32.mrf.mxu0  ;;  %v297_v12 = vpop.f32.mrf.mxu1 }
  0xac   : > { %v293_v13 = vadd.f32 %v656_v10, %v292_v11  ;;  %v298_v14 = vadd.f32 %v656_v10, %v297_v12 }
  0xb0   : > { %306 = sbr.rel (%p565_p7) target bundleno = 183 (0xb7), region = 36 }
  0xb3   : > { %v294_v15 = vpop.f32.mrf.mxu0  ;;  %v299_v16 = vpop.f32.mrf.mxu1 }
  0xb4   : > { %v295_v17 = vadd.f32 %v656_v10, %v294_v15  ;;  %v300_v18 = vadd.f32 %v656_v10, %v299_v16 }
  0xb5   : > { %v699_v19 = vmov 0.0  }
  0xb6   : > { %307 = vst [vmem:[#allocation3] sm:$0x1] %v699_v19 }
  0xb7 PF: > { %v314_v20 = vadd.f32 %v295_v17, %v293_v13  ;;  %s308_s29 = scalar_lea.vmem [#allocation2], %s564_s25  ;;  %p566_p8 = scmp.ne.s32.totalorder %s681_s12, 1 }
  0xb8   : > { %309 = vst [vmem:[%s308_s29] sm:$0xff] %v293_v13 }
  0xb9   : > { %310 = vst [vmem:[%s308_s29 + $0x8] sm:$0xff] %v295_v17  ;;  %v315_v21 = vadd.f32 %v314_v20, %v298_v14 }
  0xba   : > { %311 = vst [vmem:[%s308_s29 + $0x10] sm:$0xff] %v298_v14 }
  0xbb   : > { %312 = vst [vmem:[%s308_s29 + $0x18] sm:$0xff] %v300_v18  ;;  %v316_v22 = vadd.f32 %v315_v21, %v300_v18 }
  0xbd   : > { %v317_v23 = vrot.slane %v316_v22, 4  ;;  %v313_v28 = vld [vmem:[#allocation3] sm:$0x1] }
  0xbf   : > { %v318_v24 = vadd.f32 %v317_v23, %v316_v22 }
  0xc1   : > { %v319_v25 = vrot.slane %v318_v24, 2 }
  0xc3   : > { %v320_v26 = vadd.f32 %v319_v25, %v318_v24 }
  0xc5   : > { %v321_v27 = vrot.slane %v320_v26, 1 }
  0xc7   : > { %v322_v29 = vadd.f32 %v321_v27, %v320_v26  ;;  %328 = sbr.rel (%p566_p8) target bundleno = 274 (0x112), region = 40 }
  0xc9   : > { %v323_v30 = vadd.f32 %v322_v29, %v313_v28 }
  0xcb   : > { %324 = vst [vmem:[#allocation3] sm:$0x1] %v323_v30 }
  0xcc   : > { %v331_v33 = vld [vmem:[#allocation2] sm:$0xff]  ;;  %v332_v34 = vld [vmem:[#allocation2 + $0x8] sm:$0xff]  ;;  %v333_v35 = vld [vmem:[#allocation2 + $0x10] sm:$0xff] }
  0xcd   : > { %v334_v36 = vld [vmem:[#allocation2 + $0x18] sm:$0xff]  ;;  %v357_v37 = vld [vmem:[#allocation2 + $0x20] sm:$0xff]  ;;  %v358_v39 = vld [vmem:[#allocation2 + $0x28] sm:$0xff] }
  0xce   : > { %v359_v40 = vld [vmem:[#allocation2 + $0x30] sm:$0xff]  ;;  %v360_v41 = vld [vmem:[#allocation2 + $0x38] sm:$0xff] }
  0xd2   : > { %v329_v31 = vld [vmem:[#allocation3] sm:$0x1] }
  0xd3   : > { %v330_v32 = vmul.f32 0.015625, %v329_v31 }
  0xd5   : > { %v336_v38 = vperm.slane %v330_v32, 0 }
  0xd7   : > { %v338_v42 = vsub.f32 %v331_v33, %v336_v38  ;;  %v339_v43 = vsub.f32 %v332_v34, %v336_v38  ;;  %v340_v44 = vsub.f32 %v333_v35, %v336_v38  ;;  %v341_v45 = vsub.f32 %v334_v36, %v336_v38 }
  0xd8   : > { %v361_v46 = vsub.f32 %v357_v37, %v336_v38  ;;  %v362_v47 = vsub.f32 %v358_v39, %v336_v38  ;;  %v363_v48 = vsub.f32 %v359_v40, %v336_v38  ;;  %v364_v49 = vsub.f32 %v360_v41, %v336_v38 }
  0xd9   : > { %v342_v50 = vmul.f32 %v338_v42, %v338_v42  ;;  %v343_v51 = vmul.f32 %v339_v43, %v339_v43  ;;  %v344_v52 = vmul.f32 %v340_v44, %v340_v44  ;;  %v345_v56 = vmul.f32 %v341_v45, %v341_v45 }
  0xda   : > { %v365_v53 = vmul.f32 %v361_v46, %v361_v46  ;;  %v366_v54 = vmul.f32 %v362_v47, %v362_v47  ;;  %v367_v55 = vmul.f32 %v363_v48, %v363_v48  ;;  %v368_v58 = vmul.f32 %v364_v49, %v364_v49 }
  0xdb   : > { %v346_v57 = vadd.f32 %v343_v51, %v342_v50 }
  0xdc   : > { %v369_v59 = vadd.f32 %v366_v54, %v365_v53 }
  0xdd   : > { %v347_v60 = vadd.f32 %v346_v57, %v344_v52 }
  0xde   : > { %v370_v61 = vadd.f32 %v369_v59, %v367_v55 }
  0xdf   : > { %v348_v62 = vadd.f32 %v347_v60, %v345_v56 }
  0xe0   : > { %v371_v63 = vadd.f32 %v370_v61, %v368_v58 }
  0xe1   : > { %v349_v0 = vrot.slane %v348_v62, 4 }
  0xe2   : > { %v372_v1 = vrot.slane %v371_v63, 4 }
  0xe3   : > { %v350_v2 = vadd.f32 %v349_v0, %v348_v62 }
  0xe4   : > { %v373_v3 = vadd.f32 %v372_v1, %v371_v63 }
  0xe5   : > { %v351_v4 = vrot.slane %v350_v2, 2 }
  0xe6   : > { %v374_v5 = vrot.slane %v373_v3, 2 }
  0xe7   : > { %v352_v6 = vadd.f32 %v351_v4, %v350_v2 }
  0xe8   : > { %v375_v7 = vadd.f32 %v374_v5, %v373_v3 }
  0xe9   : > { %v353_v8 = vrot.slane %v352_v6, 1 }
  0xea   : > { %v376_v9 = vrot.slane %v375_v7, 1 }
  0xeb   : > { %v354_v10 = vadd.f32 %v353_v8, %v352_v6 }
  0xec   : > { %v377_v11 = vadd.f32 %v376_v9, %v375_v7 }
  0xee   : > { %v378_v12 = vadd.f32 %v377_v11, %v354_v10 }
  0xf0   : > { %v379_v13 = vmul.f32 0.015625, %v378_v12 }
  0xf2   : > { %v380_v14 = vadd.f32 1e-05, %v379_v13 }
  0xf4   : > { %657 = vrsqrt.f32 %v380_v14  ;;  %vm387_vm0 = vweird.f32 %v380_v14 }
  0xfa   : > { %v658_v15 = vpop.eup %657 }
  0xfb   : > { %v382_v16 = vmul.f32 %v658_v15, %v380_v14  ;;  %vm388_vm1 = vweird.f32 %v658_v15 }
  0xfc   : > { %vm389_vm2 = vmor %vm387_vm0, %vm388_vm1 }
  0xfd   : > { %v383_v17 = vmul.f32 %v658_v15, %v382_v16 }
  0xff   : > { %v384_v18 = vmul.f32 0.5, %v383_v17 }
 0x101   : > { %v385_v19 = vsub.f32 1.5, %v384_v18 }
 0x103   : > { %v386_v20 = vmul.f32 %v658_v15, %v385_v19 }
 0x105   : > { %v390_v21 = vsel %vm389_vm2, %v658_v15, %v386_v20 }
 0x106   : > { %v391_v22 = vmul.f32 %v390_v21, %v338_v42  ;;  %v392_v23 = vmul.f32 %v390_v21, %v339_v43  ;;  %v393_v24 = vmul.f32 %v390_v21, %v340_v44  ;;  %v394_v25 = vmul.f32 %v390_v21, %v341_v45 }
 0x107   : > { %v419_v26 = vmul.f32 %v390_v21, %v361_v46  ;;  %v420_v27 = vmul.f32 %v390_v21, %v362_v47  ;;  %v421_v28 = vmul.f32 %v390_v21, %v363_v48  ;;  %v422_v29 = vmul.f32 %v390_v21, %v364_v49 }
 0x108   : > { %v395_v30 = vmul.f32 0.0, %v391_v22  ;;  %v396_v31 = vmul.f32 0.0, %v392_v23  ;;  %v397_v32 = vmul.f32 0.0, %v393_v24  ;;  %v398_v33 = vmul.f32 0.0, %v394_v25 }
 0x109   : > { %v423_v34 = vmul.f32 0.0, %v419_v26  ;;  %v424_v35 = vmul.f32 0.0, %v420_v27  ;;  %v425_v36 = vmul.f32 0.0, %v421_v28  ;;  %v426_v37 = vmul.f32 0.0, %v422_v29 }
 0x10a   : > { %v399_v38 = vmax.f32 %v391_v22, %v395_v30  ;;  %v400_v39 = vmax.f32 %v392_v23, %v396_v31  ;;  %v401_v40 = vmax.f32 %v393_v24, %v397_v32  ;;  %v402_v41 = vmax.f32 %v394_v25, %v398_v33 }
 0x10b   : > { %v427_v42 = vmax.f32 %v419_v26, %v423_v34  ;;  %v428_v43 = vmax.f32 %v420_v27, %v424_v35  ;;  %v429_v44 = vmax.f32 %v421_v28, %v425_v36  ;;  %v430_v45 = vmax.f32 %v422_v29, %v426_v37 }
 0x10c   : > { %v587_v46 = vpack.c.bf16 %v400_v39, %v399_v38  ;;  %v592_v47 = vpack.c.bf16 %v402_v41, %v401_v40 }
 0x10d   : > { %v597_v48 = vpack.c.bf16 %v428_v43, %v427_v42  ;;  %v602_v49 = vpack.c.bf16 %v430_v45, %v429_v44 }
 0x10e   : > { %588 = vst [vmem:[%s761_s26] sm:$0xff] %v587_v46  }
 0x10f   : > { %604 = vst [vmem:[%s761_s26 + $0x8] sm:$0xff] %v592_v47  }
 0x110   : > { %605 = vst [vmem:[%s761_s26 + $0x10] sm:$0xff] %v597_v48  }
 0x111   : > { %606 = vst [vmem:[%s761_s26 + $0x18] sm:$0xff] %v602_v49  }
 0x112 PF: > { %s13_s16 = sadd.s32 1, %s697_s16   ;;  %s814_s12 = smov %s689_s14 }
 0x113   : > { %p10_p9 = scmp.ge.s32.totalorder %s13_s16, 6   ;;  %s815_s13 = smov %s693_s15 }
 0x114   : > { %s816_s14 = smov %s819_s17  ;;  %s817_s15 = smov %s823_s18 }
 0x115   :  { %12 = sbr.rel (!%p10_p9) target bundleno = 3 (0x3), region = 73 }

</bundles_post_ra>
